<compile_context>
chip_gen: v7x
topology: tpu7x:2x2x1
jax: 0.10.0
libtpu: 0.0.40
codegen_flags: <defaults>
</compile_context>

<pallas_src>
import functools

import jax
import jax.numpy as jnp
import numpy as np
from jax.experimental import pallas as pl
from jax.experimental.pallas import tpu as pltpu

LANES = 128            # lane width (last dim of every vreg)
NUM_CORES = 2          # v7x: 2 TensorCores/chip; harmless outer loop on v5e/v6e
MAX_TILE_CHUNKS = 512  # 512 chunks * 4 KiB/chunk = 2 MiB per input block
                       # (2 inputs * 2 pipeline bufs * 2 MiB = 8 MiB VMEM)


def _sublanes_for(dtype) -> int:
    """Packed sublane count per chunk: f32 -> 8, bf16/f16 -> 16, int8 -> 32."""
    return max(8, 32 // max(1, jnp.dtype(dtype).itemsize))


def _sq_diff_partial_kernel(x_ref, t_ref, o_ref, acc_ref, *,
                            tile_chunks, chunks_total, full_blocks):
    """Per-core partial sum of (x - t)^2 over (tile_chunks, SUB, 128) blocks."""
    c = pl.program_id(0)          # TensorCore index (parallel axis)
    i = pl.program_id(1)          # step within this core (reduction axis)
    steps = pl.num_programs(1)
    gb = c * steps + i            # UNclamped global block index

    @pl.when(i == 0)
    def _init():
        acc_ref[...] = jnp.zeros_like(acc_ref)

    d = x_ref[...].astype(jnp.float32) - t_ref[...].astype(jnp.float32)
    sq = d * d

    # Common case: block fully in range -> reduce the leading (chunk) axis onto
    # the (SUB,128) accumulator with plain vreg adds (VPU only, no XLU).
    @pl.when(gb < full_blocks)
    def _full():
        acc_ref[...] += jnp.sum(sq, axis=0)

    # Rare case: at most one real partial block per core plus clamped duplicate
    # blocks past the end.  jnp.where is a select, so NaN/garbage in the padded
    # region cannot leak into the sum.
    @pl.when(gb >= full_blocks)
    def _masked():
        chunk = jax.lax.broadcasted_iota(jnp.int32, sq.shape, 0)
        valid = (gb * tile_chunks + chunk) < chunks_total
        acc_ref[...] += jnp.sum(jnp.where(valid, sq, 0.0), axis=0)

    # Lane-dense per-core partial, written once on this core's last step.
    @pl.when(i == steps - 1)
    def _finish():
        o_ref[...] = acc_ref[...].reshape(o_ref.shape)


def _sq_diff_sum_main(x3d, t3d):
    """Sum of (x-t)^2 over a (chunks_total, SUB, 128) slab via pallas_call."""
    chunks_total, sub, _ = x3d.shape
    tile_chunks = min(MAX_TILE_CHUNKS, chunks_total)
    total_steps = pl.cdiv(chunks_total, tile_chunks)
    steps_per_core = pl.cdiv(total_steps, NUM_CORES)
    full_blocks = chunks_total // tile_chunks   # blocks fully in range

    def in_map(c, i):
        # Clamp so every DMA targets an in-range block; the kernel zeroes the
        # contribution of blocks whose UNclamped index is past the end.
        gb = c * steps_per_core + i
        return (jnp.minimum(gb, total_steps - 1), 0, 0)

    kernel = functools.partial(
        _sq_diff_partial_kernel,
        tile_chunks=tile_chunks,
        chunks_total=chunks_total,
        full_blocks=full_blocks,
    )

    bytes_accessed = (x3d.size * x3d.dtype.itemsize
                      + t3d.size * t3d.dtype.itemsize
                      + NUM_CORES * sub * LANES * 4)

    partials = pl.pallas_call(
        kernel,
        out_shape=jax.ShapeDtypeStruct((NUM_CORES, sub, LANES), jnp.float32),
        grid_spec=pltpu.PrefetchScalarGridSpec(
            num_scalar_prefetch=0,
            grid=(NUM_CORES, steps_per_core),
            in_specs=[
                pl.BlockSpec((tile_chunks, sub, LANES), in_map),
                pl.BlockSpec((tile_chunks, sub, LANES), in_map),
            ],
            out_specs=pl.BlockSpec((1, sub, LANES), lambda c, i: (c, 0, 0)),
            scratch_shapes=[pltpu.VMEM((sub, LANES), jnp.float32)],
        ),
        compiler_params=pltpu.CompilerParams(
            dimension_semantics=("parallel", "arbitrary"),
            vmem_limit_bytes=32 * 1024 * 1024,
        ),
        cost_estimate=pl.CostEstimate(
            flops=3 * x3d.size, transcendentals=0,
            bytes_accessed=bytes_accessed),
    )(x3d, t3d)

    return jnp.sum(partials)


def _mse_mean_impl(x, t):
    assert x.shape == t.shape, "input / target shapes must match"
    n = x.size
    if n == 0:
        return jnp.float32(0.0)

    sub = max(_sublanes_for(x.dtype), _sublanes_for(t.dtype))
    align = sub * LANES
    n_main = (n // align) * align

    x_flat = x.reshape(-1)
    t_flat = t.reshape(-1)

    sq_sum = jnp.float32(0.0)
    if n_main:
        chunks_total = n_main // align
        x3d = x_flat[:n_main].reshape(chunks_total, sub, LANES)
        t3d = t_flat[:n_main].reshape(chunks_total, sub, LANES)
        sq_sum = sq_sum + _sq_diff_sum_main(x3d, t3d)
    if n_main < n:
        # < align elements; plain-jnp tail avoids a whole-array pad copy of
        # the input for non-aligned element counts.
        xt = x_flat[n_main:].astype(jnp.float32)
        tt = t_flat[n_main:].astype(jnp.float32)
        sq_sum = sq_sum + jnp.sum((xt - tt) * (xt - tt))

    return (sq_sum / jnp.float32(n)).astype(jnp.float32)


@jax.custom_vjp
def mse_loss(x, t):
    """mean((x - t)^2); forward via the Pallas kernel."""
    return _mse_mean_impl(x, t)


def _mse_fwd(x, t):
    return _mse_mean_impl(x, t), (x, t)


def _mse_bwd(res, g):
    # d/dx mean((x - t)^2) = 2 (x - t) / N.  Mem-bound elementwise; plain jnp
    # runs it at HBM roofline so no custom kernel is needed for the backward.
    x, t = res
    scale = (2.0 / x.size) * g
    d = x.astype(jnp.float32) - t.astype(jnp.float32)
    gx = scale * d
    return gx.astype(x.dtype), (-gx).astype(t.dtype)


mse_loss.defvjp(_mse_fwd, _mse_bwd)


def content_loss(inp, target):
    """Equivalent of torch.nn.functional.mse_loss(inp, target) (mean reduction)."""
    return mse_loss(inp, target)


class ContentLoss:
    """Mirror of the PyTorch module: stores a detached target at init."""

    def __init__(self, target):
        self._target = jax.lax.stop_gradient(jnp.asarray(target))

    def __call__(self, inp):
        assert inp.shape == self._target.shape, "input / target shapes must match"
        return mse_loss(inp, self._target)


if __name__ == "__main__":
    key = jax.random.PRNGKey(0)
    k1, k2, k3, k4, k5, k6 = jax.random.split(key, 6)

    # Primary check: small NCHW feature map (aligned, single grid step per core).
    x = jax.random.normal(k1, (2, 4, 16, 16), dtype=jnp.float32)
    target = jax.random.normal(k2, (2, 4, 16, 16), dtype=jnp.float32)
    loss_mod = ContentLoss(target)
    out = jax.block_until_ready(loss_mod(x))
    ref = jnp.mean((x - target) ** 2)
    assert np.isclose(np.asarray(out), np.asarray(ref), rtol=1e-5, atol=1e-6), (
        f"mismatch (small): kernel={out} ref={ref}")

    # Non-aligned element count: exercises the plain-jnp tail path and the
    # masked / clamped-duplicate block on the second core.
    x2 = jax.random.normal(k3, (2, 8, 150, 150), dtype=jnp.float32)
    t2 = jax.random.normal(k4, (2, 8, 150, 150), dtype=jnp.float32)
    out2 = jax.block_until_ready(content_loss(x2, t2))
    ref2 = jnp.mean((x2 - t2) ** 2)
    assert np.isclose(np.asarray(out2), np.asarray(ref2), rtol=1e-4, atol=1e-5), (
        f"mismatch (tail): kernel={out2} ref={ref2}")

    # Multi-step grid (>512 chunks): exercises per-core accumulation across the
    # arbitrary axis, the partial last block and a fully-masked duplicate block.
    x3 = jax.random.normal(k5, (2, 4, 384, 360), dtype=jnp.float32)
    t3 = jax.random.normal(k6, (2, 4, 384, 360), dtype=jnp.float32)
    out3 = jax.block_until_ready(content_loss(x3, t3))
    ref3 = jnp.mean((x3 - t3) ** 2)
    assert np.isclose(np.asarray(out3), np.asarray(ref3), rtol=1e-4, atol=1e-5), (
        f"mismatch (multi-step): kernel={out3} ref={ref3}")

    # Gradient check for the custom VJP (style transfer optimizes the input).
    gx = jax.block_until_ready(jax.grad(mse_loss)(x, target))
    gref = 2.0 * (x - target) / x.size
    assert np.allclose(np.asarray(gx), np.asarray(gref), rtol=1e-5, atol=1e-7), (
        "gradient mismatch")

    print("KERNEL_OK")
</pallas_src>

<mosaic_0001>
module attributes {stable_mosaic.version = 11 : i64} {
  func.func @_sq_diff_partial_kernel(%arg0: i32, %arg1: i32, %arg2: memref<2x8x128xf32, #tpu.memory_space<vmem>>, %arg3: memref<2x8x128xf32, #tpu.memory_space<vmem>>, %arg4: memref<1x8x128xf32, #tpu.memory_space<vmem>>, %arg5: memref<8x128xf32, #tpu.memory_space<vmem>>) attributes {dimension_semantics = [#tpu.dimension_semantics<parallel>, #tpu.dimension_semantics<arbitrary>], iteration_bounds = array<i64: 2, 1>, scalar_prefetch = 0 : i64, scratch_operands = 1 : i64, tpu.core_type = #tpu.core_type<tc>, window_params = [{transform_indices = @transform_0, window_bounds = array<i64: 2, 8, 128>}, {transform_indices = @transform_1, window_bounds = array<i64: 2, 8, 128>}, {transform_indices = @transform_2, window_bounds = array<i64: 1, 8, 128>}]} {
    %c1_i32 = arith.constant 1 : i32
    %0 = arith.muli %arg0, %c1_i32 : i32
    %1 = arith.addi %0, %arg1 : i32
    %c0_i32 = arith.constant 0 : i32
    %2 = arith.cmpi eq, %arg1, %c0_i32 : i32
    %3 = arith.extui %2 : i1 to i32
    %c0_i32_0 = arith.constant 0 : i32
    %4 = arith.cmpi ne, %3, %c0_i32_0 : i32
    scf.if %4 {
      %cst = arith.constant 0.000000e+00 : f32
      %18 = vector.broadcast %cst : f32 to vector<8x128xf32>
      %c0_12 = arith.constant 0 : index
      %c0_13 = arith.constant 0 : index
      %19 = vector.load %arg5[%c0_12, %c0_13] : memref<8x128xf32, #tpu.memory_space<vmem>>, vector<8x128xf32>
      tpu.vector_store %arg5[%c0_12, %c0_13], %18 {strides = array<i32>} : memref<8x128xf32, #tpu.memory_space<vmem>>, vector<8x128xf32>,
    } else {
    }
    %c0 = arith.constant 0 : index
    %c0_1 = arith.constant 0 : index
    %c0_2 = arith.constant 0 : index
    %5 = vector.load %arg2[%c0, %c0_1, %c0_2] : memref<2x8x128xf32, #tpu.memory_space<vmem>>, vector<2x8x128xf32>
    %c0_3 = arith.constant 0 : index
    %c0_4 = arith.constant 0 : index
    %c0_5 = arith.constant 0 : index
    %6 = vector.load %arg3[%c0_3, %c0_4, %c0_5] : memref<2x8x128xf32, #tpu.memory_space<vmem>>, vector<2x8x128xf32>
    %7 = arith.subf %5, %6 : vector<2x8x128xf32>
    %8 = arith.mulf %7, %7 : vector<2x8x128xf32>
    %c1_i32_6 = arith.constant 1 : i32
    %9 = arith.cmpi slt, %1, %c1_i32_6 : i32
    %10 = arith.extui %9 : i1 to i32
    %c0_i32_7 = arith.constant 0 : i32
    %11 = arith.cmpi ne, %10, %c0_i32_7 : i32
    scf.if %11 {
      %c0_12 = arith.constant 0 : index
      %c0_13 = arith.constant 0 : index
      %18 = vector.load %arg5[%c0_12, %c0_13] : memref<8x128xf32, #tpu.memory_space<vmem>>, vector<8x128xf32>
      %cst = arith.constant dense<0.000000e+00> : vector<8x128xf32>
      %19 = vector.multi_reduction <add>, %8, %cst [0] : vector<2x8x128xf32> to vector<8x128xf32>
      %20 = arith.addf %18, %19 : vector<8x128xf32>
      %c0_14 = arith.constant 0 : index
      %c0_15 = arith.constant 0 : index
      %21 = vector.load %arg5[%c0_14, %c0_15] : memref<8x128xf32, #tpu.memory_space<vmem>>, vector<8x128xf32>
      tpu.vector_store %arg5[%c0_14, %c0_15], %20 {strides = array<i32>} : memref<8x128xf32, #tpu.memory_space<vmem>>, vector<8x128xf32>,
    } else {
    }
    %c1_i32_8 = arith.constant 1 : i32
    %12 = arith.cmpi sge, %1, %c1_i32_8 : i32
    %13 = arith.extui %12 : i1 to i32
    %c0_i32_9 = arith.constant 0 : i32
    %14 = arith.cmpi ne, %13, %c0_i32_9 : i32
    scf.if %14 {
      %18 = tpu.iota {dimensions = array<i32: 0>} : vector<2x8x128xi32>
      %c2_i32 = arith.constant 2 : i32
      %19 = arith.muli %1, %c2_i32 : i32
      %20 = vector.broadcast %19 : i32 to vector<2x8x128xi32>
      %21 = arith.addi %20, %18 : vector<2x8x128xi32>
      %c2_i32_12 = arith.constant 2 : i32
      %22 = vector.broadcast %c2_i32_12 : i32 to vector<2x8x128xi32>
      %23 = arith.cmpi slt, %21, %22 : vector<2x8x128xi32>
      %c0_13 = arith.constant 0 : index
      %c0_14 = arith.constant 0 : index
      %24 = vector.load %arg5[%c0_13, %c0_14] : memref<8x128xf32, #tpu.memory_space<vmem>>, vector<8x128xf32>
      %cst = arith.constant 0.000000e+00 : f32
      %25 = vector.broadcast %cst : f32 to vector<2x8x128xf32>
      %26 = arith.select %23, %8, %25 : vector<2x8x128xi1>, vector<2x8x128xf32>
      %cst_15 = arith.constant dense<0.000000e+00> : vector<8x128xf32>
      %27 = vector.multi_reduction <add>, %26, %cst_15 [0] : vector<2x8x128xf32> to vector<8x128xf32>
      %28 = arith.addf %24, %27 : vector<8x128xf32>
      %c0_16 = arith.constant 0 : index
      %c0_17 = arith.constant 0 : index
      %29 = vector.load %arg5[%c0_16, %c0_17] : memref<8x128xf32, #tpu.memory_space<vmem>>, vector<8x128xf32>
      tpu.vector_store %arg5[%c0_16, %c0_17], %28 {strides = array<i32>} : memref<8x128xf32, #tpu.memory_space<vmem>>, vector<8x128xf32>,
    } else {
    }
    %c0_i32_10 = arith.constant 0 : i32
    %15 = arith.cmpi eq, %arg1, %c0_i32_10 : i32
    %16 = arith.extui %15 : i1 to i32
    %c0_i32_11 = arith.constant 0 : i32
    %17 = arith.cmpi ne, %16, %c0_i32_11 : i32
    scf.if %17 {
      %c0_12 = arith.constant 0 : index
      %c0_13 = arith.constant 0 : index
      %18 = vector.load %arg5[%c0_12, %c0_13] : memref<8x128xf32, #tpu.memory_space<vmem>>, vector<8x128xf32>
      %19 = vector.shape_cast %18 : vector<8x128xf32> to vector<1x8x128xf32>
      %c0_14 = arith.constant 0 : index
      %c0_15 = arith.constant 0 : index
      %c0_16 = arith.constant 0 : index
      %20 = vector.load %arg4[%c0_14, %c0_15, %c0_16] : memref<1x8x128xf32, #tpu.memory_space<vmem>>, vector<1x8x128xf32>
      tpu.vector_store %arg4[%c0_14, %c0_15, %c0_16], %19 {strides = array<i32>} : memref<1x8x128xf32, #tpu.memory_space<vmem>>, vector<1x8x128xf32>,
    } else {
    }
    return
  }
  func.func @transform_0(%arg0: i32, %arg1: i32) -> (i32, i32, i32) {
    %c1_i32 = arith.constant 1 : i32
    %0 = arith.muli %arg0, %c1_i32 : i32
    %1 = arith.addi %0, %arg1 : i32
    %c0_i32 = arith.constant 0 : i32
    %2 = arith.minsi %1, %c0_i32 : i32
    %c0_i32_0 = arith.constant 0 : i32
    %c0_i32_1 = arith.constant 0 : i32
    %c0_i32_2 = arith.constant 0 : i32
    return %2, %c0_i32_0, %c0_i32_1 : i32, i32, i32
  }
  func.func @transform_1(%arg0: i32, %arg1: i32) -> (i32, i32, i32) {
    %c1_i32 = arith.constant 1 : i32
    %0 = arith.muli %arg0, %c1_i32 : i32
    %1 = arith.addi %0, %arg1 : i32
    %c0_i32 = arith.constant 0 : i32
    %2 = arith.minsi %1, %c0_i32 : i32
    %c0_i32_0 = arith.constant 0 : i32
    %c0_i32_1 = arith.constant 0 : i32
    %c0_i32_2 = arith.constant 0 : i32
    return %2, %c0_i32_0, %c0_i32_1 : i32, i32, i32
  }
  func.func @transform_2(%arg0: i32, %arg1: i32) -> (i32, i32, i32) {
    %c0_i32 = arith.constant 0 : i32
    %c0_i32_0 = arith.constant 0 : i32
    %c0_i32_1 = arith.constant 0 : i32
    return %arg0, %c0_i32, %c0_i32_0 : i32, i32, i32
  }
}

</mosaic_0001>

<bundles_post_ra>
// kernel: tpu_custom_call.1
= control target key start
LH: loop header
LB: loop body
LE: loop exit
PB: predicated region body
PF: predicated region fallthrough
CT: control target
= control target key end

     0   :  { %7 = vsyncpa [#allocation4], 0  ;;  %s911_s0 = inlined_call_operand.hbm [shape: f32[2,8,128], index: 0, kind: input, shape index: {}]   ;;  %s912_s1 = inlined_call_operand.hbm [shape: f32[2,8,128], index: 1, kind: input, shape index: {}]   ;;  %s913_s2 = inlined_call_operand.hbm [shape: f32[2,8,128], index: 2, kind: output, shape index: {}]  }
   0x1   :  { %9 = vsyncpa [#allocation4 + $0x1], 0 }
   0x2   :  { %10 = vsyncpa [#allocation7], 0 }
   0x3   :  { %12 = vsyncpa [#allocation7 + $0x1], 0 }
   0x4   :  { %13 = vsyncpa [#allocation5], 0 }
   0x5   :  { %15 = vsyncpa [#allocation5 + $0x1], 0  ;;  %s704_s9 = smov 0   ;;  %s706_s10 = smov 0  }
   0x6   :  { %s708_s11 = smov 0   ;;  %s710_s12 = smov 0  }
   0x7   :  { %s712_s13 = smov 0   ;;  %s714_s14 = smov 0  }
   0x8   :  { %s716_s15 = smov 0   ;;  %s718_s16 = smov 0  }
   0x9 LB: > { %s397_s17 = sadd.s32 4294967295, %s681_s16   ;;  %s398_s18 = sadd.s32 4294967294, %s681_s16   ;;  %s681_s16 = sphi %s718_s16, %s21_s16   ;;  %s677_s15 = sphi %s716_s15, %s932_s15   ;;  %s673_s14 = sphi %s714_s14, %s931_s14   ;;  %s669_s13 = sphi %s712_s13, %s901_s13   ;;  %s665_s12 = sphi %s710_s12, %s930_s12   ;;  %s661_s11 = sphi %s708_s11, %s929_s11   ;;  %s657_s10 = sphi %s706_s10, %s928_s10   ;;  %s653_s9 = sphi %s704_s9, %s927_s9  }
   0xa   : > { %s33_s19 = sadd.s32 1, %s677_s15  ;;  %p650_p1 = scmp.ne.s32.totalorder %s669_s13, 0 }
   0xb   : > { %p35_p0 = scmp.ge.s32.totalorder %s33_s19, 2  ;;  %p54_p2 = scmp.eq.s32.totalorder %s681_s16, 0 }
   0xc   : > { %p59_p3 = scmp.ne.s32.totalorder %s669_s13, %s665_s12  ;;  %p60_p5 = scmp.eq.s32.totalorder %s397_s17, 0 }
   0xd   : > { %s934_s19 = smov (%p35_p0, %s33_s19), 0  ;;  %p750_p4 = por %p650_p1, %p54_p2 }
   0xe   : > { %p754_p6 = por %p60_p5, %p59_p3  ;;  %s101_s22 = ssub.s32 %s677_s15, %s934_s19 }
   0xf   : > { %p102_p7 = scmp.eq.s32.totalorder %s101_s22, 0  ;;  %s104_s23 = sadd.s32 1, %s661_s11 }
  0x10   : > { %s917_s21 = scalar_select %p754_p6, 1, 0 }
  0x11   : > { %s762_s24 = scalar_select %p102_p7, %s661_s11, %s104_s23  }
  0x12   : > { %p114_p8 = scmp.ne.s32.totalorder %s661_s11, %s657_s10  ;;  %p115_p9 = scmp.eq.s32.totalorder %s397_s17, 1 }
  0x13   : > { %p120_p10 = scmp.ne.s32.totalorder %s657_s10, %s653_s9  ;;  %p121_p11 = scmp.eq.s32.totalorder %s398_s18, 1 }
  0x14   : > { %p768_p12 = por %p115_p9, %p114_p8  ;;  %p437_p1 = scmp.lt.s32.totalorder %s681_s16, 2 }
  0x15   : > { %p773_p0 = por %p121_p11, %p120_p10  ;;  %s683_s27 = smov [#allocation3]  }
  0x16   : > { %s918_s25 = scalar_select %p768_p12, 1, 0 }
  0x17   : > { %s919_s26 = scalar_select %p773_p0, 1, 0 }
  0x18   : > { %s155_s28 = sshll.u32 %s683_s27, 4  ;;  %p780_p2 = pnand %p437_p1, %p750_p4  ;;  %s156_s28 = int_to_ptr.vmem [resolvable:$true] %s155_s28 }
  0x19   : > { %s514_s4 = scalar_lea.hbm %s911_s0, 256 }
  0x1a   : > { %p515_p3 = scmp.ne.s32.totalorder %s911_s0, %s514_s4  ;;  %p516_p5 = pneg %p780_p2 }
  0x1b   : > { %p521_p8 = scmp.lt.u32.totalorder %s514_s4, %s514_s4  ;;  %p523_p9 = scmp.lt.u32.totalorder %s514_s4, %s911_s0 }
  0x1c   : > { %p517_p7 = pnand %p516_p5, %p515_p3 }
  0x1d   : > { %p524_p10 = por %p523_p9, %p521_p8 }
  0x1e   : > { %p518_p4 = pneg %p517_p7 }
  0x20   : > { %p525_p11 = pnand %p524_p10, %p518_p4 }
  0x22   : > { %528 = shalt.err (!%p525_p11)
}
  0x23   : > { %s529_s12 = scalar_lea.vmem %s156_s28, 256  ;;  %s536_s17 = scalar_lea.vmem %s156_s28, 512 }
  0x24   : > { %p530_p1 = scmp.ne.s32.totalorder %s156_s28, %s529_s12  ;;  %p537_p12 = scmp.lt.s32.totalorder %s156_s28, %s156_s28 }
  0x25   : > { %p538_p6 = scmp.lt.s32.totalorder %s536_s17, %s529_s12 }
  0x26   : > { %p532_p13 = pnand %p530_p1, %p516_p5 }
  0x27   : > { %p539_p3 = por %p538_p6, %p537_p12 }
  0x28   : > { %p533_p0 = pneg %p532_p13 }
  0x2a   : > { %p540_p7 = pnand %p539_p3, %p533_p0 }
  0x2c   : > { %543 = shalt.err (!%p540_p7)
}
  0x2d   : > { %s684_s18 = smov 128   ;;  %s685_s20 = smov 8  }
  0x2e   : > { %429 = dma.hbm_to_vmem [thread:$0]  (!%p780_p2), %s911_s0, 256, %s156_s28, [#allocation4], %s684_s18, %s684_s18, %s685_s20  }
  0x2f   : > { %p407_p13 = scmp.ge.s32.totalorder %s681_s16, 1  ;;  %p187_p4 = scmp.lt.s32.totalorder %s681_s16, 3 }
  0x30   : > { %s686_s30 = smov [#allocation6]   ;;  %s544_s6 = scalar_lea.hbm %s912_s1, 256 }
  0x31   : > { %p811_p8 = pnand %p407_p13, %p187_p4  ;;  %s179_s3 = sshll.u32 %s686_s30, 4  ;;  %s180_s3 = int_to_ptr.vmem [resolvable:$true] %s179_s3 }
  0x32   : > { %p545_p6 = scmp.ne.s32.totalorder %s912_s1, %s544_s6  ;;  %p551_p9 = scmp.lt.u32.totalorder %s544_s6, %s544_s6 }
  0x33   : > { %s921_s27 = scalar_select %p811_p8, 1, 0 }
  0x34   : > { %p547_p12 = pnand %p545_p6, %p516_p5  ;;  %p553_p10 = scmp.lt.u32.totalorder %s544_s6, %s912_s1 }
  0x36   : > { %p548_p0 = pneg %p547_p12  ;;  %p554_p11 = por %p553_p10, %p551_p9 }
  0x38   : > { %p555_p1 = pnand %p554_p11, %p548_p0 }
  0x3a   : > { %558 = shalt.err (!%p555_p1)
}
  0x3b   : > { %s559_s17 = scalar_lea.vmem %s180_s3, 256  ;;  %s566_s22 = scalar_lea.vmem %s180_s3, 512 }
  0x3c   : > { %p560_p3 = scmp.ne.s32.totalorder %s180_s3, %s559_s17  ;;  %p567_p4 = scmp.lt.s32.totalorder %s180_s3, %s180_s3 }
  0x3d   : > { %p568_p8 = scmp.lt.s32.totalorder %s566_s22, %s559_s17 }
  0x3e   : > { %p562_p7 = pnand %p560_p3, %p516_p5 }
  0x3f   : > { %p569_p6 = por %p568_p8, %p567_p4 }
  0x40   : > { %p563_p13 = pneg %p562_p7 }
  0x42   : > { %p570_p12 = pnand %p569_p6, %p563_p13 }
  0x44   : > { %573 = shalt.err (!%p570_p12)
}
  0x45   : > { %432 = dma.hbm_to_vmem [thread:$0]  (!%p780_p2), %s912_s1, 256, %s180_s3, [#allocation7], %s684_s18, %s684_s18, %s685_s20  }
  0x46   : > { %p922_p0 = scmp.ne.s32.totalorder %s921_s27, 0 }
  0x47   : > { %s193_s4 = sand.u32 (!%p922_p0), 1, %s669_s13   ;;  %p923_p5 = scmp.ne.s32.totalorder (!%p922_p0), %s917_s21, 0 }
  0x48   : > { %191 = sbr.rel (%p922_p0) target bundleno = 131 (0x83), region = 28  ;;  %s408_s5 = sshll.u32 (!%p922_p0), %s193_s4, 4 }
  0x49   : > { %s194_s6 = scalar_lea.sflag (!%p922_p0), [#allocation4], %s193_s4  ;;  %s197_s7 = scalar_lea.vmem (!%p922_p0), [#allocation3], %s408_s5 }
  0x4f   : > { %639 = dma.done.wait (%p923_p5), %s194_s6, 256  }
  0x50   : > { %641 = vsyncadd (%p923_p5), %s194_s6, 4294967040  ;;  %s203_s29 = scalar_lea.sflag [#allocation7], %s193_s4  ;;  %s206_s8 = scalar_lea.vmem [#allocation6], %s408_s5 }
  0x51   : > { %643 = dma.done.wait (%p923_p5), %s203_s29, 256  }
  0x52   : > { %645 = vsyncadd (%p923_p5), %s203_s29, 4294967040  ;;  %s229_s18 = sand.u32 1, %s657_s10   ;;  %v687_v0 = vmov 0.0   ;;  %v246_v1 = vld [vmem:[%s197_s7] sm:$0xff]  ;;  %v247_v2 = vld [vmem:[%s197_s7 + $0x8] sm:$0xff]  ;;  %p411_p2 = scmp.ge.s32.totalorder %s673_s14, 1 }
  0x53   : > { %s852_s20 = sshll.u32 %s229_s18, 3  ;;  %245 = vst [vmem:[#allocation2] sm:$0xff] %v687_v0  ;;  %v248_v3 = vld [vmem:[%s206_s8] sm:$0xff]  ;;  %v249_v4 = vld [vmem:[%s206_s8 + $0x8] sm:$0xff] }
  0x54   : > { %v250_v5 = vsub.f32 %v246_v1, %v248_v3  ;;  %v251_v6 = vsub.f32 %v247_v2, %v249_v4  ;;  %s231_s27 = scalar_lea.vmem [#allocation8], %s852_s20  ;;  %257 = sbr.rel (%p411_p2) target bundleno = 94 (0x5e), region = 44 }
  0x56   : > { %v252_v7 = vmul.f32 %v250_v5, %v250_v5  ;;  %v253_v8 = vmul.f32 %v251_v6, %v251_v6 }
  0x58   : > { %v259_v10 = vadd.f32 (!%p411_p2), %v253_v8, %v252_v7 }
  0x5a   : > { %v258_v9 = vld [vmem:[#allocation2] sm:$0xff] (!%p411_p2) }
  0x5b   : > { %v260_v11 = vadd.f32 %v259_v10, %v258_v9 }
  0x5d   : > { %261 = vst [vmem:[#allocation2] sm:$0xff] %v260_v11 }
  0x5e PF: > { %p412_p8 = scmp.lt.s32.totalorder %s673_s14, 1 }
  0x5f   : > { %s413_s21 = sshll.u32 (!%p412_p8), %s673_s14, 1 }
  0x60   : > { %265 = sbr.rel (%p412_p8) target bundleno = 106 (0x6a), region = 48  ;;  %v267_v12 = vstv (!%p412_p8), %s413_s21 }
  0x61   : > { %v268_v13 = vadd.s32 (!%p412_p8), 1, %v267_v12  ;;  %vm269_vm0 = vcmp.lt.s32.totalorder (!%p412_p8), %v267_v12, 2 }
  0x62   : > { %v272_v14 = vsel (!%p412_p8), %vm269_vm0, %v252_v7, 0.0 }
  0x63   : > { %vm270_vm1 = vcmp.lt.s32.totalorder (!%p412_p8), %v268_v13, 2 }
  0x64   : > { %v271_v15 = vld [vmem:[#allocation2] sm:$0xff] (!%p412_p8)  ;;  %v273_v16 = vsel (!%p412_p8), %vm270_vm1, %v253_v8, 0.0 }
  0x65   : > { %v274_v17 = vadd.f32 (!%p412_p8), %v273_v16, %v272_v14 }
  0x67   : > { %v275_v18 = vadd.f32 %v274_v17, %v271_v15 }
  0x69   : > { %276 = vst [vmem:[#allocation2] sm:$0xff] %v275_v18 }
  0x6a PF: > { %s415_s3 = sshll.u32 %s673_s14, 7  ;;  %s296_s22 = sshll.u32 %s231_s27, 4  ;;  %s297_s22 = int_to_ptr.vmem [resolvable:$true] %s296_s22 }
  0x6b   : > { %s862_s17 = scalar_lea.hbm %s913_s2, %s415_s3  ;;  %s283_s23 = scalar_lea.sflag [#allocation5], %s229_s18 }
  0x6c   : > { %s574_s30 = scalar_lea.vmem %s297_s22, 128  ;;  %p924_p10 = scmp.ne.s32.totalorder %s918_s25, 0 }
  0x6d   : > { %p575_p9 = scmp.ne.s32.totalorder %s297_s22, %s574_s30  ;;  %s688_s4 = smov [#allocation8]  }
  0x6e   : > { %s578_s5 = sshll.u32 %s688_s4, 4  ;;  %s579_s5 = int_to_ptr.vmem [resolvable:$false] %s578_s5 }
  0x6f   : > { %p576_p11 = pnand %p575_p9, %p924_p10  ;;  %s580_s6 = scalar_lea.vmem %s579_s5, 256 }
  0x70   : > { %v280_v19 = vld [vmem:[#allocation2] sm:$0xff]  ;;  %p581_p3 = scmp.lt.s32.totalorder %s297_s22, %s579_s5  ;;  %p582_p7 = scmp.lt.s32.totalorder %s580_s6, %s574_s30 }
  0x71   : > { %281 = vst [vmem:[%s231_s27] sm:$0xff] %v280_v19  ;;  %p577_p1 = pneg %p576_p11 }
  0x72   : > { %p583_p13 = por %p582_p7, %p581_p3 }
  0x74   : > { %p584_p4 = pnand %p583_p13, %p577_p1 }
  0x76   : > { %587 = shalt.err (!%p584_p4)
}
  0x77   : > { %s588_s14 = scalar_lea.hbm %s862_s17, 128  ;;  %s592_s8 = scalar_lea.hbm %s913_s2, 256 }
  0x78   : > { %p589_p6 = scmp.ne.s32.totalorder %s862_s17, %s588_s14  ;;  %p593_p5 = scmp.lt.u32.totalorder %s862_s17, %s913_s2 }
  0x79   : > { %p594_p2 = scmp.lt.u32.totalorder %s592_s8, %s588_s14  ;;  %p596_p9 = scmp.lt.u32.totalorder %s588_s14, %s862_s17 }
  0x7a   : > { %p590_p12 = pnand %p589_p6, %p924_p10 }
  0x7b   : > { %p595_p8 = por %p594_p2, %p593_p5 }
  0x7c   : > { %p591_p0 = pneg %p590_p12 }
  0x7d   : > { %p597_p11 = por %p596_p9, %p595_p8 }
  0x7f   : > { %p598_p1 = pnand %p597_p11, %p591_p0 }
  0x81   : > { %601 = shalt.err (!%p598_p1)
}
  0x82   : > { %424 = dma.vmem_to_hbm [thread:$0]  (%p924_p10), %s297_s22, 128, %s862_s17, %s283_s23  }
  0x83 PF: > { %s308_s27 = sand.u32 1, %s653_s9   ;;  %p925_p3 = scmp.ne.s32.totalorder %s919_s26, 0 }
  0x84   : > { %p926_p7 = scmp.ge.s32.totalorder %s681_s16, 2  ;;  %s309_s21 = scalar_lea.sflag [#allocation5], %s308_s27 }
  0x86   : > { %p434_p13 = pnand %p926_p7, %p925_p3 }
  0x88   : > { %647 = dma.done.wait (!%p434_p13), %s309_s21, 128  }
  0x89   : > { %649 = vsyncadd (!%p434_p13), %s309_s21, 4294967168  ;;  %s21_s16 = sadd.s32 1, %s681_s16   ;;  %s927_s9 = smov %s657_s10 }
  0x8a   : > { %p18_p4 = scmp.ge.s32.totalorder %s21_s16, 4   ;;  %s928_s10 = smov %s661_s11 }
  0x8b   : > { %s929_s11 = smov %s762_s24  ;;  %s930_s12 = smov %s669_s13 }
  0x8c   : > { %s901_s13 = smov 0   ;;  %s931_s14 = smov %s677_s15 }
  0x8d   : > { %s932_s15 = smov %s934_s19  ;;  %20 = sbr.rel (!%p18_p4) target bundleno = 9 (0x9), region = 102 }
  0x94   :  { %314 = vsyncpa [#allocation4], 1 }
  0x95   :  { %316 = vsyncpa [#allocation4 + $0x1], 1 }
  0x96   :  { %317 = vsyncpa [#allocation7], 1 }
  0x97   :  { %319 = vsyncpa [#allocation7 + $0x1], 1 }
  0x98   :  { %320 = vsyncpa [#allocation5], 1 }
  0x99   :  { %322 = vsyncpa [#allocation5 + $0x1], 1 }

</bundles_post_ra>
